<compile_context>
chip_gen: v7x
topology: tpu7x:2x2x1
jax: 0.10.0
libtpu: 0.0.40
codegen_flags: <defaults>
</compile_context>

<pallas_src>
import jax
import jax.numpy as jnp
from jax.experimental import pallas as pl
from jax.experimental.pallas import tpu as pltpu

_LANE = 128
_SUBLANE = 8


def _round_up(x, m):
    return (x + m - 1) // m * m


def _make_mlp_kernel(n_parts):
    """3-layer MLP with the input concat fused in-kernel.

    refs layout: [part_0..part_{n-1}, w1_0..w1_{n-1}, b1, w2, b2, w3, b3, out]
    Parts / weights arrive in the compute dtype (bf16); biases are f32 and all
    accumulation, bias-add and ReLU happen in f32.
    """

    def kernel(*refs):
        part_refs = refs[:n_parts]
        w1_refs = refs[n_parts:2 * n_parts]
        b1_ref, w2_ref, b2_ref, w3_ref, b3_ref, o_ref = refs[2 * n_parts:]

        # Layer 1: fused concat -> sum of partial matmuls (f32 accumulation).
        h1 = b1_ref[...]                                   # (1, H) f32, broadcasts
        for p_ref, w_ref in zip(part_refs, w1_refs):
            h1 = h1 + jnp.dot(p_ref[...], w_ref[...],
                              preferred_element_type=jnp.float32)
        h1 = jnp.maximum(h1, 0.0)                          # ReLU in f32

        # Layer 2.
        h2 = jnp.dot(h1.astype(w2_ref.dtype), w2_ref[...],
                     preferred_element_type=jnp.float32) + b2_ref[...]
        h2 = jnp.maximum(h2, 0.0)

        # Layer 3 (output lane dim padded to 128 -> unmasked stores).
        out = jnp.dot(h2.astype(w3_ref.dtype), w3_ref[...],
                      preferred_element_type=jnp.float32) + b3_ref[...]
        o_ref[...] = out.astype(o_ref.dtype)

    return kernel


def diayn_discriminator_forward(graph, state, next_state, params, *,
                                use_state=True,
                                compute_dtype=jnp.bfloat16,
                                batch_tile=512):
    """Forward pass of the DIAYN discriminator MLP via a Pallas TPU kernel."""
    if use_state:
        parts = [graph, state, next_state]
    else:
        parts = [graph, next_state]
    n_parts = len(parts)

    B = parts[0].shape[0]
    part_dims = [int(p.shape[1]) for p in parts]
    d_in = sum(part_dims)

    w1, b1, w2, b2, w3, b3 = (params[k] for k in ("w1", "b1", "w2", "b2", "w3", "b3"))
    H = int(w1.shape[1])
    C = int(w3.shape[1])
    assert int(w1.shape[0]) == d_in, "W1 rows must match concatenated input size"

    # --- layout plumbing (wrapper side, cheap / constant-foldable) ---
    # Split W1 row-wise so the concat can be fused into the kernel.
    offs = [0]
    for d in part_dims:
        offs.append(offs[-1] + d)
    w1_parts = [w1[offs[i]:offs[i + 1], :].astype(compute_dtype)
                for i in range(n_parts)]

    # Pad the output lane dimension to a multiple of 128 (lane-dense stores).
    c_pad = _round_up(C, _LANE)
    w3_p = jnp.pad(w3, ((0, 0), (0, c_pad - C))).astype(compute_dtype)
    b3_p = jnp.pad(b3, ((0, 0), (0, c_pad - C))).astype(jnp.float32)

    w2_c = w2.astype(compute_dtype)
    b1_f = b1.astype(jnp.float32)
    b2_f = b2.astype(jnp.float32)

    # Batch tiling: round tile to sublane granularity, pad batch to tile.
    tb = min(batch_tile, _round_up(B, _SUBLANE))
    tb = _round_up(tb, _SUBLANE)
    b_pad = _round_up(B, tb)

    def prep(p):
        if b_pad != p.shape[0]:
            p = jnp.pad(p, ((0, b_pad - p.shape[0]), (0, 0)))
        return p.astype(compute_dtype)

    parts = [prep(p) for p in parts]
    nb = b_pad // tb

    # BlockSpecs: streamed activations tile over the batch; weights/biases use
    # constant index_maps so they stay VMEM-resident for the whole grid.
    stream = lambda d: pl.BlockSpec((tb, d), lambda i: (i, 0))
    pinned = lambda shape: pl.BlockSpec(shape, lambda i: (0, 0))

    in_specs = (
        [stream(d) for d in part_dims]
        + [pinned(w.shape) for w in w1_parts]
        + [pinned(b1_f.shape), pinned(w2_c.shape), pinned(b2_f.shape),
           pinned(w3_p.shape), pinned(b3_p.shape)]
    )

    # Advisory cost estimate for XLA's scheduler.
    flops = 2 * b_pad * (d_in * H + H * H + H * c_pad)
    bytes_accessed = (
        sum(p.size * p.dtype.itemsize for p in parts)
        + sum(w.size * w.dtype.itemsize for w in w1_parts)
        + w2_c.size * w2_c.dtype.itemsize
        + w3_p.size * w3_p.dtype.itemsize
        + (b1_f.size + b2_f.size + b3_p.size) * 4
        + b_pad * c_pad * 4
    )

    out = pl.pallas_call(
        _make_mlp_kernel(n_parts),
        out_shape=jax.ShapeDtypeStruct((b_pad, c_pad), jnp.float32),
        grid_spec=pltpu.PrefetchScalarGridSpec(
            num_scalar_prefetch=0,
            grid=(nb,),
            in_specs=in_specs,
            out_specs=pl.BlockSpec((tb, c_pad), lambda i: (i, 0)),
        ),
        compiler_params=pltpu.CompilerParams(
            dimension_semantics=("parallel",),
        ),
        cost_estimate=pl.CostEstimate(
            flops=flops, transcendentals=0, bytes_accessed=bytes_accessed),
    )(*parts, *w1_parts, b1_f, w2_c, b2_f, w3_p, b3_p)

    return out[:B, :C]


def init_params(key, input_size, hidden_dim, num_classes):
    """Deterministic synthetic parameters matching nn.Linear shapes
    (stored pre-transposed as (in, out) for x @ W)."""
    ks = jax.random.split(key, 6)
    s = lambda fan_in: 1.0 / jnp.sqrt(jnp.float32(fan_in))
    return {
        "w1": jax.random.uniform(ks[0], (input_size, hidden_dim), jnp.float32,
                                 -s(input_size), s(input_size)),
        "b1": jax.random.uniform(ks[1], (1, hidden_dim), jnp.float32,
                                 -s(input_size), s(input_size)),
        "w2": jax.random.uniform(ks[2], (hidden_dim, hidden_dim), jnp.float32,
                                 -s(hidden_dim), s(hidden_dim)),
        "b2": jax.random.uniform(ks[3], (1, hidden_dim), jnp.float32,
                                 -s(hidden_dim), s(hidden_dim)),
        "w3": jax.random.uniform(ks[4], (hidden_dim, num_classes), jnp.float32,
                                 -s(hidden_dim), s(hidden_dim)),
        "b3": jax.random.uniform(ks[5], (1, num_classes), jnp.float32,
                                 -s(hidden_dim), s(hidden_dim)),
    }


if __name__ == "__main__":
    # Small config consistent with the module's __init__:
    #   obs_dim=8, graph_encoding_size=16, use_state=True
    #   -> input_size = 16 + 8 + 8 = 32 ; hidden_dim=32 ; num_classes (skill_dim)=8
    batch = 8
    obs_dim = 8
    graph_encoding_size = 16
    hidden_dim = 32
    num_classes = 8
    use_state = True
    input_size = graph_encoding_size + obs_dim + (obs_dim if use_state else 0)

    key = jax.random.PRNGKey(0)
    k_g, k_s, k_n, k_p = jax.random.split(key, 4)
    graph = jax.random.normal(k_g, (batch, graph_encoding_size), jnp.float32)
    state = jax.random.normal(k_s, (batch, obs_dim), jnp.float32)
    next_state = jax.random.normal(k_n, (batch, obs_dim), jnp.float32)

    params = init_params(k_p, input_size, hidden_dim, num_classes)

    skill_pred = diayn_discriminator_forward(graph, state, next_state, params,
                                             use_state=use_state)
    jax.block_until_ready(skill_pred)

    # Pure-JAX f32 reference of the same semantics. The kernel uses bf16 MXU
    # operands (f32 accumulation), so tolerance is loosened accordingly.
    x = jnp.concatenate([graph, state, next_state], axis=-1)
    h1 = jnp.maximum(x @ params["w1"] + params["b1"], 0.0)
    h2 = jnp.maximum(h1 @ params["w2"] + params["b2"], 0.0)
    ref = h2 @ params["w3"] + params["b3"]

    assert skill_pred.shape == (batch, num_classes)
    max_err = float(jnp.max(jnp.abs(skill_pred - ref)))
    assert jnp.allclose(skill_pred, ref, atol=5e-2, rtol=5e-2), max_err

    print("KERNEL_OK")
</pallas_src>

<mosaic_0001>
module attributes {stable_mosaic.version = 11 : i64} {
  func.func @kernel(%arg0: i32, %arg1: memref<8x16xbf16, #tpu.memory_space<vmem>>, %arg2: memref<8x8xbf16, #tpu.memory_space<vmem>>, %arg3: memref<8x8xbf16, #tpu.memory_space<vmem>>, %arg4: memref<16x32xbf16, #tpu.memory_space<vmem>>, %arg5: memref<8x32xbf16, #tpu.memory_space<vmem>>, %arg6: memref<8x32xbf16, #tpu.memory_space<vmem>>, %arg7: memref<1x32xf32, #tpu.memory_space<vmem>>, %arg8: memref<32x32xbf16, #tpu.memory_space<vmem>>, %arg9: memref<1x32xf32, #tpu.memory_space<vmem>>, %arg10: memref<32x128xbf16, #tpu.memory_space<vmem>>, %arg11: memref<1x128xf32, #tpu.memory_space<vmem>>, %arg12: memref<8x128xf32, #tpu.memory_space<vmem>>) attributes {dimension_semantics = [#tpu.dimension_semantics<parallel>], iteration_bounds = array<i64: 1>, scalar_prefetch = 0 : i64, scratch_operands = 0 : i64, tpu.core_type = #tpu.core_type<tc>, window_params = [{transform_indices = @transform_0, window_bounds = array<i64: 8, 16>}, {transform_indices = @transform_1, window_bounds = array<i64: 8, 8>}, {transform_indices = @transform_2, window_bounds = array<i64: 8, 8>}, {pipeline_mode = #tpu.pipeline_mode<synchronous>, transform_indices = @transform_3, window_bounds = array<i64: 16, 32>}, {pipeline_mode = #tpu.pipeline_mode<synchronous>, transform_indices = @transform_4, window_bounds = array<i64: 8, 32>}, {pipeline_mode = #tpu.pipeline_mode<synchronous>, transform_indices = @transform_5, window_bounds = array<i64: 8, 32>}, {pipeline_mode = #tpu.pipeline_mode<synchronous>, transform_indices = @transform_6, window_bounds = array<i64: 1, 32>}, {pipeline_mode = #tpu.pipeline_mode<synchronous>, transform_indices = @transform_7, window_bounds = array<i64: 32, 32>}, {pipeline_mode = #tpu.pipeline_mode<synchronous>, transform_indices = @transform_8, window_bounds = array<i64: 1, 32>}, {pipeline_mode = #tpu.pipeline_mode<synchronous>, transform_indices = @transform_9, window_bounds = array<i64: 32, 128>}, {pipeline_mode = #tpu.pipeline_mode<synchronous>, transform_indices = @transform_10, window_bounds = array<i64: 1, 128>}, {transform_indices = @transform_11, window_bounds = array<i64: 8, 128>}]} {
    %c0 = arith.constant 0 : index
    %c0_0 = arith.constant 0 : index
    %0 = vector.load %arg7[%c0, %c0_0] : memref<1x32xf32, #tpu.memory_space<vmem>>, vector<1x32xf32>
    %c0_1 = arith.constant 0 : index
    %c0_2 = arith.constant 0 : index
    %1 = vector.load %arg1[%c0_1, %c0_2] : memref<8x16xbf16, #tpu.memory_space<vmem>>, vector<8x16xbf16>
    %c0_3 = arith.constant 0 : index
    %c0_4 = arith.constant 0 : index
    %2 = vector.load %arg4[%c0_3, %c0_4] : memref<16x32xbf16, #tpu.memory_space<vmem>>, vector<16x32xbf16>
    %cst = arith.constant dense<0.000000e+00> : vector<8x32xf32>
    %3 = tpu.matmul %1, %2, %cst {dimension_numbers = #tpu.dot_dimension_numbers<[1], [0], [0], [1], [0, 0, 1, 1], [], []>} : vector<8x16xbf16>, vector<16x32xbf16>, vector<8x32xf32> -> vector<8x32xf32>
    %4 = vector.broadcast %0 : vector<1x32xf32> to vector<8x32xf32>
    %5 = arith.addf %4, %3 : vector<8x32xf32>
    %c0_5 = arith.constant 0 : index
    %c0_6 = arith.constant 0 : index
    %6 = vector.load %arg2[%c0_5, %c0_6] : memref<8x8xbf16, #tpu.memory_space<vmem>>, vector<8x8xbf16>
    %c0_7 = arith.constant 0 : index
    %c0_8 = arith.constant 0 : index
    %7 = vector.load %arg5[%c0_7, %c0_8] : memref<8x32xbf16, #tpu.memory_space<vmem>>, vector<8x32xbf16>
    %cst_9 = arith.constant dense<0.000000e+00> : vector<8x32xf32>
    %8 = tpu.matmul %6, %7, %cst_9 {dimension_numbers = #tpu.dot_dimension_numbers<[1], [0], [0], [1], [0, 0, 1, 1], [], []>} : vector<8x8xbf16>, vector<8x32xbf16>, vector<8x32xf32> -> vector<8x32xf32>
    %9 = arith.addf %5, %8 : vector<8x32xf32>
    %c0_10 = arith.constant 0 : index
    %c0_11 = arith.constant 0 : index
    %10 = vector.load %arg3[%c0_10, %c0_11] : memref<8x8xbf16, #tpu.memory_space<vmem>>, vector<8x8xbf16>
    %c0_12 = arith.constant 0 : index
    %c0_13 = arith.constant 0 : index
    %11 = vector.load %arg6[%c0_12, %c0_13] : memref<8x32xbf16, #tpu.memory_space<vmem>>, vector<8x32xbf16>
    %cst_14 = arith.constant dense<0.000000e+00> : vector<8x32xf32>
    %12 = tpu.matmul %10, %11, %cst_14 {dimension_numbers = #tpu.dot_dimension_numbers<[1], [0], [0], [1], [0, 0, 1, 1], [], []>} : vector<8x8xbf16>, vector<8x32xbf16>, vector<8x32xf32> -> vector<8x32xf32>
    %13 = arith.addf %9, %12 : vector<8x32xf32>
    %cst_15 = arith.constant 0.000000e+00 : f32
    %14 = vector.broadcast %cst_15 : f32 to vector<8x32xf32>
    %15 = arith.maximumf %13, %14 : vector<8x32xf32>
    %16 = arith.truncf %15 : vector<8x32xf32> to vector<8x32xbf16>
    %c0_16 = arith.constant 0 : index
    %c0_17 = arith.constant 0 : index
    %17 = vector.load %arg8[%c0_16, %c0_17] : memref<32x32xbf16, #tpu.memory_space<vmem>>, vector<32x32xbf16>
    %cst_18 = arith.constant dense<0.000000e+00> : vector<8x32xf32>
    %18 = tpu.matmul %16, %17, %cst_18 {dimension_numbers = #tpu.dot_dimension_numbers<[1], [0], [0], [1], [0, 0, 1, 1], [], []>} : vector<8x32xbf16>, vector<32x32xbf16>, vector<8x32xf32> -> vector<8x32xf32>
    %c0_19 = arith.constant 0 : index
    %c0_20 = arith.constant 0 : index
    %19 = vector.load %arg9[%c0_19, %c0_20] : memref<1x32xf32, #tpu.memory_space<vmem>>, vector<1x32xf32>
    %20 = vector.broadcast %19 : vector<1x32xf32> to vector<8x32xf32>
    %21 = arith.addf %18, %20 : vector<8x32xf32>
    %cst_21 = arith.constant 0.000000e+00 : f32
    %22 = vector.broadcast %cst_21 : f32 to vector<8x32xf32>
    %23 = arith.maximumf %21, %22 : vector<8x32xf32>
    %24 = arith.truncf %23 : vector<8x32xf32> to vector<8x32xbf16>
    %c0_22 = arith.constant 0 : index
    %c0_23 = arith.constant 0 : index
    %25 = vector.load %arg10[%c0_22, %c0_23] : memref<32x128xbf16, #tpu.memory_space<vmem>>, vector<32x128xbf16>
    %cst_24 = arith.constant dense<0.000000e+00> : vector<8x128xf32>
    %26 = tpu.matmul %24, %25, %cst_24 {dimension_numbers = #tpu.dot_dimension_numbers<[1], [0], [0], [1], [0, 0, 1, 1], [], []>} : vector<8x32xbf16>, vector<32x128xbf16>, vector<8x128xf32> -> vector<8x128xf32>
    %c0_25 = arith.constant 0 : index
    %c0_26 = arith.constant 0 : index
    %27 = vector.load %arg11[%c0_25, %c0_26] : memref<1x128xf32, #tpu.memory_space<vmem>>, vector<1x128xf32>
    %28 = vector.broadcast %27 : vector<1x128xf32> to vector<8x128xf32>
    %29 = arith.addf %26, %28 : vector<8x128xf32>
    %c0_27 = arith.constant 0 : index
    %c0_28 = arith.constant 0 : index
    %30 = vector.load %arg12[%c0_27, %c0_28] : memref<8x128xf32, #tpu.memory_space<vmem>>, vector<8x128xf32>
    tpu.vector_store %arg12[%c0_27, %c0_28], %29 {strides = array<i32>} : memref<8x128xf32, #tpu.memory_space<vmem>>, vector<8x128xf32>,
    return
  }
  func.func @transform_0(%arg0: i32) -> (i32, i32) {
    %c0_i32 = arith.constant 0 : i32
    %c0_i32_0 = arith.constant 0 : i32
    return %arg0, %c0_i32 : i32, i32
  }
  func.func @transform_1(%arg0: i32) -> (i32, i32) {
    %c0_i32 = arith.constant 0 : i32
    %c0_i32_0 = arith.constant 0 : i32
    return %arg0, %c0_i32 : i32, i32
  }
  func.func @transform_2(%arg0: i32) -> (i32, i32) {
    %c0_i32 = arith.constant 0 : i32
    %c0_i32_0 = arith.constant 0 : i32
    return %arg0, %c0_i32 : i32, i32
  }
  func.func @transform_3(%arg0: i32) -> (i32, i32) {
    %c0_i32 = arith.constant 0 : i32
    %c0_i32_0 = arith.constant 0 : i32
    %c0_i32_1 = arith.constant 0 : i32
    return %c0_i32, %c0_i32_0 : i32, i32
  }
  func.func @transform_4(%arg0: i32) -> (i32, i32) {
    %c0_i32 = arith.constant 0 : i32
    %c0_i32_0 = arith.constant 0 : i32
    %c0_i32_1 = arith.constant 0 : i32
    return %c0_i32, %c0_i32_0 : i32, i32
  }
  func.func @transform_5(%arg0: i32) -> (i32, i32) {
    %c0_i32 = arith.constant 0 : i32
    %c0_i32_0 = arith.constant 0 : i32
    %c0_i32_1 = arith.constant 0 : i32
    return %c0_i32, %c0_i32_0 : i32, i32
  }
  func.func @transform_6(%arg0: i32) -> (i32, i32) {
    %c0_i32 = arith.constant 0 : i32
    %c0_i32_0 = arith.constant 0 : i32
    %c0_i32_1 = arith.constant 0 : i32
    return %c0_i32, %c0_i32_0 : i32, i32
  }
  func.func @transform_7(%arg0: i32) -> (i32, i32) {
    %c0_i32 = arith.constant 0 : i32
    %c0_i32_0 = arith.constant 0 : i32
    %c0_i32_1 = arith.constant 0 : i32
    return %c0_i32, %c0_i32_0 : i32, i32
  }
  func.func @transform_8(%arg0: i32) -> (i32, i32) {
    %c0_i32 = arith.constant 0 : i32
    %c0_i32_0 = arith.constant 0 : i32
    %c0_i32_1 = arith.constant 0 : i32
    return %c0_i32, %c0_i32_0 : i32, i32
  }
  func.func @transform_9(%arg0: i32) -> (i32, i32) {
    %c0_i32 = arith.constant 0 : i32
    %c0_i32_0 = arith.constant 0 : i32
    %c0_i32_1 = arith.constant 0 : i32
    return %c0_i32, %c0_i32_0 : i32, i32
  }
  func.func @transform_10(%arg0: i32) -> (i32, i32) {
    %c0_i32 = arith.constant 0 : i32
    %c0_i32_0 = arith.constant 0 : i32
    %c0_i32_1 = arith.constant 0 : i32
    return %c0_i32, %c0_i32_0 : i32, i32
  }
  func.func @transform_11(%arg0: i32) -> (i32, i32) {
    %c0_i32 = arith.constant 0 : i32
    %c0_i32_0 = arith.constant 0 : i32
    return %arg0, %c0_i32 : i32, i32
  }
}

</mosaic_0001>

<bundles_post_ra>
// kernel: tpu_custom_call.1
= control target key start
LH: loop header
LB: loop body
LE: loop exit
PB: predicated region body
PF: predicated region fallthrough
CT: control target
= control target key end

     0   :  { %16 = vsyncpa [#allocation3], 0  ;;  %s867_s0 = inlined_call_operand.hbm [shape: bf16[8,16], index: 0, kind: input, shape index: {}]   ;;  %s868_s1 = inlined_call_operand.hbm [shape: bf16[8,8], index: 1, kind: input, shape index: {}]   ;;  %s869_s2 = inlined_call_operand.hbm [shape: bf16[8,8], index: 2, kind: input, shape index: {}]   ;;  %s870_s3 = inlined_call_operand.hbm [shape: bf16[16,32], index: 3, kind: input, shape index: {}]   ;;  %s871_s4 = inlined_call_operand.hbm [shape: bf16[8,32], index: 4, kind: input, shape index: {}]   ;;  %s872_s5 = inlined_call_operand.hbm [shape: bf16[8,32], index: 5, kind: input, shape index: {}]   ;;  %s873_s6 = inlined_call_operand.vmem [shape: f32[1,32], index: 6, kind: input, shape index: {}]   ;;  %s874_s7 = inlined_call_operand.vmem [shape: bf16[32,32], index: 7, kind: input, shape index: {}]   ;;  %s875_s8 = inlined_call_operand.vmem [shape: f32[1,32], index: 8, kind: input, shape index: {}]   ;;  %s876_s9 = inlined_call_operand.vmem [shape: bf16[32,128], index: 9, kind: input, shape index: {}]   ;;  %s877_s10 = inlined_call_operand.vmem [shape: f32[1,128], index: 10, kind: input, shape index: {}]   ;;  %s878_s11 = inlined_call_operand.hbm [shape: f32[8,128], index: 11, kind: output, shape index: {}]  }
   0x1   :  { %17 = vsyncpa [#allocation6], 0 }
   0x2   :  { %18 = vsyncpa [#allocation9], 0 }
   0x3   :  { %19 = vsyncpa [#allocation12], 0 }
   0x4   :  { %20 = vsyncpa [#allocation4], 0  ;;  %s677_s17 = smov [#allocation5]   ;;  %s678_s19 = smov [#allocation8]  }
   0x5   :  { %s37_s18 = sshll.u32 %s677_s17, 4  ;;  %s56_s20 = sshll.u32 %s678_s19, 4  ;;  %s38_s18 = int_to_ptr.vmem [resolvable:$true] %s37_s18  ;;  %s748_s20 = int_to_ptr.vmem [resolvable:$true] %s56_s20 }
   0x6   :  { %s513_s23 = scalar_lea.hbm %s868_s1, 64 }
   0x7   :  { %p514_p0 = scmp.ne.s32.totalorder %s868_s1, %s513_s23  ;;  %p517_p1 = scmp.lt.u32.totalorder %s513_s23, %s868_s1 }
   0x9   :  { %p519_p2 = pnand %p517_p1, %p514_p0 }
   0xb   :  { %522 = shalt.err (!%p519_p2)
}
   0xc   :  { %s523_s28 = scalar_lea.vmem %s38_s18, 64  ;;  %p528_p4 = scmp.lt.s32.totalorder %s38_s18, %s38_s18 }
   0xd   :  { %p524_p3 = scmp.ne.s32.totalorder %s38_s18, %s523_s28  ;;  %p529_p5 = scmp.lt.s32.totalorder %s523_s28, %s523_s28 }
   0xf   :  { %p530_p6 = por %p529_p5, %p528_p4 }
  0x11   :  { %p531_p7 = pnand %p530_p6, %p524_p3 }
  0x13   :  { %534 = shalt.err (!%p531_p7)
}
  0x14   :  { %40 = dma.hbm_to_vmem [thread:$0]  %s868_s1, 64, %s38_s18, [#allocation6]  }
  0x15   :  { %s535_s14 = scalar_lea.hbm %s870_s3, 128 }
  0x16   :  { %p536_p8 = scmp.ne.s32.totalorder %s870_s3, %s535_s14  ;;  %p539_p9 = scmp.lt.u32.totalorder %s535_s14, %s870_s3 }
  0x18   :  { %p541_p10 = pnand %p539_p9, %p536_p8 }
  0x1a   :  { %544 = shalt.err (!%p541_p10)
}
  0x1b   :  { %s545_s21 = scalar_lea.vmem %s748_s20, 128  ;;  %p550_p12 = scmp.lt.s32.totalorder %s748_s20, %s748_s20 }
  0x1c   :  { %p546_p11 = scmp.ne.s32.totalorder %s748_s20, %s545_s21  ;;  %p551_p13 = scmp.lt.s32.totalorder %s545_s21, %s545_s21 }
  0x1e   :  { %p552_p0 = por %p551_p13, %p550_p12 }
  0x20   :  { %p553_p1 = pnand %p552_p0, %p546_p11 }
  0x22   :  { %556 = shalt.err (!%p553_p1)
}
  0x23   :  { %s679_s1 = smov 64   ;;  %s680_s18 = smov 4  }
  0x24   :  { %62 = dma.hbm_to_vmem [thread:$0]  %s870_s3, 128, %s748_s20, [#allocation9], %s679_s1, %s679_s1, %s680_s18  }
  0x25   :  { %s681_s24 = smov [#allocation2]   ;;  %s682_s26 = smov [#allocation7]  }
  0x26   :  { %s27_s25 = sshll.u32 %s681_s24, 4  ;;  %s47_s27 = sshll.u32 %s682_s26, 4  ;;  %s28_s25 = int_to_ptr.vmem [resolvable:$true] %s27_s25  ;;  %s48_s27 = int_to_ptr.vmem [resolvable:$true] %s47_s27 }
  0x27   :  { %s557_s30 = scalar_lea.hbm %s867_s0, 64 }
  0x28   :  { %p558_p2 = scmp.ne.s32.totalorder %s867_s0, %s557_s30  ;;  %p561_p3 = scmp.lt.u32.totalorder %s557_s30, %s867_s0 }
  0x2a   :  { %p563_p4 = pnand %p561_p3, %p558_p2 }
  0x2c   :  { %566 = shalt.err (!%p563_p4)
}
  0x2d   :  { %s567_s3 = scalar_lea.vmem %s28_s25, 64  ;;  %p572_p6 = scmp.lt.s32.totalorder %s28_s25, %s28_s25 }
  0x2e   :  { %p568_p5 = scmp.ne.s32.totalorder %s28_s25, %s567_s3  ;;  %p573_p7 = scmp.lt.s32.totalorder %s567_s3, %s567_s3 }
  0x30   :  { %p574_p8 = por %p573_p7, %p572_p6 }
  0x32   :  { %p575_p9 = pnand %p574_p8, %p568_p5 }
  0x34   :  { %578 = shalt.err (!%p575_p9)
}
  0x35   :  { %30 = dma.hbm_to_vmem [thread:$0]  %s867_s0, 64, %s28_s25, [#allocation3]  }
  0x36   :  { %s579_s21 = scalar_lea.hbm %s869_s2, 64 }
  0x37   :  { %p580_p10 = scmp.ne.s32.totalorder %s869_s2, %s579_s21  ;;  %p583_p11 = scmp.lt.u32.totalorder %s579_s21, %s869_s2 }
  0x39   :  { %p585_p12 = pnand %p583_p11, %p580_p10 }
  0x3b   :  { %588 = shalt.err (!%p585_p12)
}
  0x3c   :  { %s589_s24 = scalar_lea.vmem %s48_s27, 64  ;;  %p594_p0 = scmp.lt.s32.totalorder %s48_s27, %s48_s27 }
  0x3d   :  { %p590_p13 = scmp.ne.s32.totalorder %s48_s27, %s589_s24  ;;  %p595_p1 = scmp.lt.s32.totalorder %s589_s24, %s589_s24 }
  0x3f   :  { %p596_p2 = por %p595_p1, %p594_p0 }
  0x41   :  { %p597_p3 = pnand %p596_p2, %p590_p13 }
  0x43   :  { %600 = shalt.err (!%p597_p3)
}
  0x44   :  { %50 = dma.hbm_to_vmem [thread:$0]  %s869_s2, 64, %s48_s27, [#allocation6]  }
  0x45   :  { %s683_s26 = smov [#allocation10]   ;;  %s684_s29 = smov [#allocation11]  }
  0x46   :  { %s69_s28 = sshll.u32 %s683_s26, 4  ;;  %s79_s30 = sshll.u32 %s684_s29, 4  ;;  %s70_s28 = int_to_ptr.vmem [resolvable:$true] %s69_s28  ;;  %s80_s30 = int_to_ptr.vmem [resolvable:$true] %s79_s30 }
  0x47   :  { %s601_s14 = scalar_lea.hbm %s871_s4, 64 }
  0x48   :  { %p602_p4 = scmp.ne.s32.totalorder %s871_s4, %s601_s14  ;;  %p605_p5 = scmp.lt.u32.totalorder %s601_s14, %s871_s4 }
  0x4a   :  { %p607_p6 = pnand %p605_p5, %p602_p4 }
  0x4c   :  { %610 = shalt.err (!%p607_p6)
}
  0x4d   :  { %s611_s2 = scalar_lea.vmem %s70_s28, 64  ;;  %p616_p8 = scmp.lt.s32.totalorder %s70_s28, %s70_s28 }
  0x4e   :  { %p612_p7 = scmp.ne.s32.totalorder %s70_s28, %s611_s2  ;;  %p617_p9 = scmp.lt.s32.totalorder %s611_s2, %s611_s2 }
  0x50   :  { %p618_p10 = por %p617_p9, %p616_p8 }
  0x52   :  { %p619_p11 = pnand %p618_p10, %p612_p7 }
  0x54   :  { %622 = shalt.err (!%p619_p11)
}
  0x55   :  { %72 = dma.hbm_to_vmem [thread:$0]  %s871_s4, 64, %s70_s28, [#allocation9]  }
  0x56   :  { %s623_s1 = scalar_lea.hbm %s872_s5, 64 }
  0x57   :  { %p624_p12 = scmp.ne.s32.totalorder %s872_s5, %s623_s1  ;;  %p627_p13 = scmp.lt.u32.totalorder %s623_s1, %s872_s5 }
  0x59   :  { %p629_p0 = pnand %p627_p13, %p624_p12 }
  0x5b   :  { %632 = shalt.err (!%p629_p0)
}
  0x5c   :  { %s633_s0 = scalar_lea.vmem %s80_s30, 64  ;;  %p638_p2 = scmp.lt.s32.totalorder %s80_s30, %s80_s30 }
  0x5d   :  { %p634_p1 = scmp.ne.s32.totalorder %s80_s30, %s633_s0  ;;  %p639_p3 = scmp.lt.s32.totalorder %s633_s0, %s633_s0 }
  0x5f   :  { %p640_p4 = por %p639_p3, %p638_p2 }
  0x61   :  { %p641_p5 = pnand %p640_p4, %p634_p1 }
  0x63   :  { %644 = shalt.err (!%p641_p5)
}
  0x64   :  { %82 = dma.hbm_to_vmem [thread:$0]  %s872_s5, 64, %s80_s30, [#allocation12]  }
  0x65   :  { %667 = dma.done.wait [#allocation3], 64  }
  0x66   :  { %668 = vsyncadd [#allocation3], 4294967232 }
  0x67   :  { %669 = dma.done.wait [#allocation6], 128  }
  0x68   :  { %670 = vsyncadd [#allocation6], 4294967168 }
  0x69   :  { %671 = dma.done.wait [#allocation9], 192  }
  0x6a   :  { %672 = vsyncadd [#allocation9], 4294967104 }
  0x6b   :  { %673 = dma.done.wait [#allocation12], 64  }
  0x6c   :  { %674 = vsyncadd [#allocation12], 4294967232  ;;  %v685_v0 = vmov 0.0   ;;  %vm686_vm0 = vmmov 0   ;;  %v508_v1 = vld [vmem:[#allocation8] sm:$0xff]   ;;  %vm179_vm1 = vcmask 1043456  }
  0x6d   :  { %454 = vmatprep.subr.bf16.mxu0 %v685_v0  ;;  %456 = vmatprep.mubr.msk.bf16.mxu0 %vm686_vm0, %v685_v0  ;;  %v174_v2 = vld [vmem:[#allocation10] sm:$0xf]  ;;  %v113_v3 = vld [vmem:[#allocation2] sm:$0xf]  ;;  %vm122_vm2 = vcmask 130048   ;;  %vm175_vm3 = vcmask 64512  }
  0x6e   :  { %472 = vmatprep.subr.bf16.mxu1 %v685_v0  ;;  %476 = vmatprep.mubr.msk.bf16.mxu1 %vm686_vm0, %v685_v0  ;;  %v181_v4 = vsel %vm179_vm1, %v174_v2, 0  ;;  %v225_v5 = vld [vmem:[#allocation11] sm:$0xf]  ;;  %v173_v6 = vld [vmem:[#allocation5] sm:$0xf]  ;;  %v510_v10 = vld [vmem:[%s874_s7 + $0x8] sm:$0xff]  }
  0x6f   :  { %455 = vmatpush3.bf16.msra.mxu0 %v508_v1  ;;  %v230_v7 = vsel %vm179_vm1, %v225_v5, 0  ;;  %v224_v8 = vld [vmem:[#allocation7] sm:$0xf]  ;;  %v509_v9 = vld [vmem:[%s874_s7] sm:$0xff]   ;;  %vm298_vm4 = vcmask 261120   ;;  %s687_s2 = smov [#allocation13]  }
  0x70   :  { %460 = vmatprep.subr.bf16.mxu0 %v685_v0  ;;  %473 = vmatpush3.bf16.msra.mxu1 %v509_v9  ;;  %v431_v11 = vld [vmem:[%s873_s6] ss:$0 sm:$0xff]  ;;  %v512_v20 = vld [vmem:[%s876_s9 + $0x8] sm:$0xff]  }
  0x71   :  { %474 = vmatprep.subr.bf16.mxu1 %v685_v0  ;;  %v511_v19 = vld [vmem:[%s876_s9] sm:$0xff]   ;;  %s417_s9 = sshll.u32 %s687_s2, 4  ;;  %s418_s9 = int_to_ptr.vmem [resolvable:$true] %s417_s9 }
  0x72   :  { %457 = vmatmul.mubr.msk.bf16.vlgmr.msra.gmra.mrb[0].mxu0 %vm122_vm2, %v113_v3  ;;  %v434_v21 = vld [vmem:[%s875_s8] ss:$0 sm:$0xff]  ;;  %s645_s8 = scalar_lea.vmem %s418_s9, 128  ;;  %p650_p7 = scmp.lt.s32.totalorder %s418_s9, %s418_s9 }
  0x73   :  { %461 = vmatpush3.bf16.msra.mxu0 %v181_v4  ;;  %462 = vmatprep.mubr.msk.bf16.mxu0 %vm686_vm0, %v685_v0  ;;  %v438_v29 = vld [vmem:[%s877_s10] ss:$0 sm:$0xff]  ;;  %p646_p6 = scmp.ne.s32.totalorder %s418_s9, %s645_s8  ;;  %p651_p8 = scmp.lt.s32.totalorder %s645_s8, %s645_s8 }
  0x74   :  { %466 = vmatprep.subr.bf16.mxu0 %v685_v0  ;;  %475 = vmatpush3.bf16.msra.mxu1 %v510_v10 }
  0x75   :  { %480 = vmatprep.subr.bf16.mxu1 %v685_v0  ;;  %p652_p9 = por %p651_p8, %p650_p7 }
  0x77   :  { %p653_p10 = pnand %p652_p9, %p646_p6 }
  0x7e   :  { %463 = vmatmul.mubr.msk.bf16.vlgmr.msra.gmra.mrb[0].mxu0 %vm175_vm3, %v173_v6 }
  0x7f   :  { %467 = vmatpush3.bf16.msra.mxu0 %v230_v7  ;;  %468 = vmatprep.mubr.msk.bf16.mxu0 %vm686_vm0, %v685_v0 }
  0x8a   :  { %469 = vmatmul.mubr.msk.bf16.vlgmr.msra.gmra.mrb[0].mxu0 %vm175_vm3, %v224_v8 }
 0x15d   :  { %v266_v12 = vpop.f32.mrb[0].mxu0 }
 0x15e   :  { %v488_v13 = vadd.f32 %v431_v11, %v266_v12  ;;  %v470_v14 = vpop.f32.mrb[1].mxu0 }
 0x15f   :  { %v269_v15 = vpop.f32.mrb[2].mxu0 }
 0x160   :  { %v273_v16 = vmax.f32 %v488_v13, 0.0  ;;  %v471_v17 = vpop.f32.mrb[3].mxu0 }
 0x162   :  { %v274_v18 = vpack.c.bf16 %v273_v16, %v273_v16 }
 0x164   :  { %477 = vmatmul.mubr.msk.bf16.vlgmr.msra.gmra.mrb[0].mxu1 %vm298_vm4, %v274_v18 }
 0x165   :  { %484 = vmatprep.mubr.msk.bf16.mxu1 %vm686_vm0, %v685_v0  ;;  %481 = vmatpush3.bf16.msra.mxu1 %v511_v19 }
 0x166   :  { %482 = vmatprep.subr.bf16.mxu1 %v685_v0 }
 0x169   :  { %483 = vmatpush3.bf16.msra.mxu1 %v512_v20 }
 0x237   :  { %v336_v22 = vpop.f32.mrb[0].mxu1 }
 0x238   :  { %v337_v23 = vadd.f32 %v434_v21, %v336_v22  ;;  %v478_v24 = vpop.f32.mrb[1].mxu1 }
 0x239   :  { %v339_v25 = vpop.f32.mrb[2].mxu1 }
 0x23a   :  { %v342_v26 = vmax.f32 %v337_v23, 0.0  ;;  %v479_v27 = vpop.f32.mrb[3].mxu1 }
 0x23c   :  { %v343_v28 = vpack.c.bf16 %v342_v26, %v342_v26 }
 0x23e   :  { %485 = vmatmul.mubr.msk.bf16.vlgmr.msra.gmra.mrb[4].mxu1 %vm298_vm4, %v343_v28 }
 0x311   :  { %v404_v30 = vpop.f32.mrb[4].mxu1 }
 0x312   :  { %v405_v31 = vadd.f32 %v438_v29, %v404_v30  ;;  %v486_v32 = vpop.f32.mrb[5].mxu1 }
 0x313   :  { %v407_v33 = vpop.f32.mrb[6].mxu1 }
 0x314   :  { %410 = vst [vmem:[#allocation13] sm:$0xff] %v405_v31  ;;  %v487_v34 = vpop.f32.mrb[7].mxu1 }
 0x315   :  { %656 = shalt.err (!%p653_p10)
}
 0x316   :  { %s657_s10 = scalar_lea.hbm %s878_s11, 128 }
 0x317   :  { %p658_p11 = scmp.ne.s32.totalorder %s878_s11, %s657_s10  ;;  %p661_p12 = scmp.lt.u32.totalorder %s657_s10, %s878_s11 }
 0x319   :  { %p663_p13 = pnand %p661_p12, %p658_p11 }
 0x31b   :  { %666 = shalt.err (!%p663_p13)
}
 0x31c   :  { %420 = dma.vmem_to_hbm [thread:$0]  %s418_s9, 128, %s878_s11, [#allocation4]  }
 0x31d   :  { %675 = dma.done.wait [#allocation4], 128  }
 0x31e   :  { %676 = vsyncadd [#allocation4], 4294967168 }
 0x31f   :  { %424 = vsyncpa [#allocation3], 1 }
 0x320   :  { %425 = vsyncpa [#allocation6], 1 }
 0x321   :  { %426 = vsyncpa [#allocation9], 1 }
 0x322   :  { %427 = vsyncpa [#allocation12], 1 }
 0x323   :  { %428 = vsyncpa [#allocation4], 1 }

</bundles_post_ra>
